<compile_context>
chip_gen: v5e
topology: v5e:2x2
jax: 0.10.0
libtpu: 0.0.40
codegen_flags: <defaults>
</compile_context>

<pallas_src>
import math
import jax
import jax.numpy as jnp
from jax import lax
from jax.experimental import pallas as pl
from jax.experimental.pallas import tpu as pltpu


# --------------------------------------------------------------------------------------
# Fused GraphUnet kernel (one grid step per batch element, all layers inside)
# --------------------------------------------------------------------------------------
def make_graph_unet_kernel(n_layers):
    n_pool = n_layers - 1

    def kernel(nrem_ref, x_ref, a_ref, m_ref, *rest):
        # rest = [W1, b1, ..., Wn, bn, p1, ..., p_{n-1}, fc_w, fc_b, out_ref]
        wb_refs = rest[:2 * n_layers]
        proj_refs = rest[2 * n_layers:2 * n_layers + n_pool]
        fcw_ref = rest[2 * n_layers + n_pool]
        fcb_ref = rest[2 * n_layers + n_pool + 1]
        o_ref = rest[2 * n_layers + n_pool + 2]

        b = pl.program_id(0)
        x = x_ref[0]                      # [N, Cin]
        a = a_ref[0]                      # [N, N]  original adjacency (kept unmasked)
        m = m_ref[0]                      # [N, 1]  running node mask
        n = a.shape[0]

        ri = lax.broadcasted_iota(jnp.int32, (n, n), 0)
        ci = lax.broadcasted_iota(jnp.int32, (n, n), 1)
        eye_b = ri == ci                  # only used for vector layout flips / tie-break

        # Bit-exact [1,N] <-> [N,1] flips without MXU pushes or transposes:
        # select the diagonal and reduce (adding exact zeros preserves the value).
        def row_to_col(v_row):            # [1, N] -> [N, 1]
            return jnp.sum(jnp.where(eye_b, v_row, 0.0), axis=1, keepdims=True)

        def col_to_row(v_col):            # [N, 1] -> [1, N]
            return jnp.sum(jnp.where(eye_b, v_col, 0.0), axis=0, keepdims=True)

        for layer in range(n_layers):
            w = wb_refs[2 * layer][...]          # [Cin, F]
            bias = wb_refs[2 * layer + 1][...]   # [1, F]

            # ---- GraphConv (K=1).  Effective adjacency:
            #        layer 0 : A            (spec uses the raw input A)
            #        layer>0 : m * A * m^T  (pooling's A-update, applied lazily)
            #      A_hat = A_eff + I ; D = (sum_i A_hat[i,j] + 1e-5)^-0.5 (torch dim=1)
            #      out = relu(((L @ x) @ W + b) * m),  L@h computed as d*(A_eff@(d*h) + d*h)
            if layer == 0:
                a_rows = a
            else:
                a_rows = m * a                                   # rows masked (VPU)
            csum_row = jnp.sum(a_rows, axis=0, keepdims=True)    # [1, N] column sums
            colsum = row_to_col(csum_row)                        # [N, 1]
            if layer > 0:
                colsum = colsum * m                              # column mask
            d = lax.rsqrt(colsum + 1.0 + 1e-5)                   # +1 accounts for +I

            h = jnp.dot(x, w, preferred_element_type=jnp.float32)  # x @ W (bias added later)
            dh = d * h
            if layer == 0:
                av = jnp.dot(a_rows, dh, preferred_element_type=jnp.float32)
            else:
                av = jnp.dot(a_rows, m * dh, preferred_element_type=jnp.float32)
            x = jnp.maximum((d * (av + dh) + bias) * m, 0.0)     # bias, mask, ReLU

            if layer < n_layers - 1:
                # ---- Graph pooling: drop the n_remove masked-in nodes with the smallest
                # projection score (ascending y, ties broken by node index).
                p_hat = proj_refs[layer][...]                    # [1, F], unit L2 norm
                y = jnp.sum(x * p_hat, axis=1, keepdims=True)    # [N,1] == (x @ p) / ||p||
                nrem = nrem_ref[b * n_pool + layer].astype(jnp.float32)
                z = jnp.where(m > 0.0, y, jnp.float32(1e30))     # masked-out never precedes
                z_row = col_to_row(z)                            # [1, N], bit-exact copy
                prec = (z_row < y) | ((z_row == y) & (ci < ri))  # node j precedes node i
                rank = jnp.sum(jnp.where(prec, 1.0, 0.0), axis=1, keepdims=True)  # [N, 1]
                keep = jnp.where(rank >= nrem, 1.0, 0.0)
                m = m * keep
                x = x * jnp.tanh(y) * m
                # A <- m*A*m^T is folded into the next layer's a_rows / colsum masking.

        # ---- Readout: max over nodes (masked rows are exactly 0 and features are >=0
        # after ReLU, matching the reference's torch.max over all rows) + final Linear.
        # TODO(synk): nn.Dropout(p=0.2) in the classifier is identity (inference mode).
        xm = jnp.max(x, axis=0, keepdims=True)                   # [1, F]
        o_ref[0] = (jnp.dot(xm, fcw_ref[...], preferred_element_type=jnp.float32)
                    + fcb_ref[...]).astype(o_ref.dtype)

    return kernel


# --------------------------------------------------------------------------------------
# Wrapper: parameter prep + single fused pallas_call
# --------------------------------------------------------------------------------------
def graph_unet_forward(params, x, A, mask_col, n_nodes, pooling_ratios):
    gconv = params["gconv"]
    projs = params["proj"]
    n_layers = len(gconv)
    n_pool = n_layers - 1
    B, N, Cin = x.shape
    O = params["fc_w"].shape[1]

    # glue: per-pool-layer N_remove, matching (N_nodes.float() * (1 - ratio)).long()
    # on the running node count (pure integer math on inputs; no kernel output needed).
    if n_pool > 0:
        nn = n_nodes.astype(jnp.float32)
        cols = []
        for l in range(n_pool):
            nr = (nn * jnp.float32(1.0 - pooling_ratios[l])).astype(jnp.int32)
            cols.append(nr)
            nn = nn - nr.astype(jnp.float32)
        nrem = jnp.stack(cols, axis=1).reshape(B * n_pool)       # b-major flat layout
    else:
        nrem = jnp.zeros((1,), jnp.int32)

    # glue: projection vectors pre-normalized (y = x@p / ||p||) and laid out as [1, F] rows
    # so the in-kernel score is a lane-wise multiply + reduce instead of a K=1 MXU matmul.
    proj_rows = [(p / jnp.sqrt(jnp.sum(p * p))).reshape(1, -1) for p in projs]

    in_arrays = [x, A, mask_col]
    in_specs = [
        pl.BlockSpec((1, N, Cin), lambda bi, nrem_r: (bi, 0, 0)),
        pl.BlockSpec((1, N, N), lambda bi, nrem_r: (bi, 0, 0)),
        pl.BlockSpec((1, N, 1), lambda bi, nrem_r: (bi, 0, 0)),
    ]

    def bcast_spec(arr):
        return pl.BlockSpec(arr.shape, lambda bi, nrem_r: (0,) * arr.ndim)

    for (W, bb) in gconv:
        in_arrays += [W, bb]
        in_specs += [bcast_spec(W), bcast_spec(bb)]
    for pr in proj_rows:
        in_arrays.append(pr)
        in_specs.append(bcast_spec(pr))
    in_arrays += [params["fc_w"], params["fc_b"]]
    in_specs += [bcast_spec(params["fc_w"]), bcast_spec(params["fc_b"])]

    grid_spec = pltpu.PrefetchScalarGridSpec(
        num_scalar_prefetch=1,
        grid=(B,),
        in_specs=in_specs,
        out_specs=pl.BlockSpec((1, 1, O), lambda bi, nrem_r: (bi, 0, 0)),
    )
    out = pl.pallas_call(
        make_graph_unet_kernel(n_layers),
        grid_spec=grid_spec,
        out_shape=jax.ShapeDtypeStruct((B, 1, O), jnp.float32),
        # Batch axis is independent -> "parallel": shards across v7x's two TensorCores,
        # no-op on single-core v5e/v6e.
        compiler_params=pltpu.CompilerParams(dimension_semantics=("parallel",)),
    )(nrem, *in_arrays)
    return out.reshape(B, O)


# --------------------------------------------------------------------------------------
# Deterministic parameter init + example run
# --------------------------------------------------------------------------------------
def init_params(key, in_features, filters, out_features):
    keys = jax.random.split(key, 2 * len(filters) + len(filters) - 1 + 2)
    k = 0

    def uni(kk, shape, bound):
        return jax.random.uniform(kk, shape, jnp.float32, minval=-bound, maxval=bound)

    gconv = []
    cin = in_features
    for f in filters:
        bound = 1.0 / math.sqrt(cin)
        W = uni(keys[k], (cin, f), bound); k += 1
        b = uni(keys[k], (1, f), bound); k += 1
        gconv.append((W, b))
        cin = f

    proj = []
    for l in range(len(filters) - 1):
        bound = 1.0 / math.sqrt(filters[l])
        proj.append(uni(keys[k], (filters[l], 1), bound)); k += 1

    bound = 1.0 / math.sqrt(filters[-1])
    fc_w = uni(keys[k], (filters[-1], out_features), bound); k += 1
    fc_b = uni(keys[k], (1, out_features), bound); k += 1
    return {"gconv": gconv, "proj": proj, "fc_w": fc_w, "fc_b": fc_b}


if __name__ == "__main__":
    B, N = 2, 16
    in_features = 8
    filters = [32, 32, 32]
    out_features = 4
    pooling_ratios = [0.8, 0.8]

    key = jax.random.PRNGKey(0)
    kx, ka, kp = jax.random.split(key, 3)

    x = jax.random.normal(kx, (B, N, in_features), jnp.float32)
    n_nodes = jnp.array([16, 12], dtype=jnp.int32)
    node_ids = jnp.arange(N)
    mask = (node_ids[None, :] < n_nodes[:, None]).astype(jnp.float32)     # [B, N]

    a_rand = jax.random.uniform(ka, (B, N, N), jnp.float32)
    A = ((a_rand + jnp.swapaxes(a_rand, 1, 2)) > 1.0).astype(jnp.float32)
    A = A * (1.0 - jnp.eye(N, dtype=jnp.float32))                          # zero diagonal
    A = A * mask[:, :, None] * mask[:, None, :]                            # respect padding
    mask_col = mask[:, :, None]                                            # [B, N, 1]

    params = init_params(kp, in_features, filters, out_features)

    out = graph_unet_forward(params, x, A, mask_col, n_nodes, pooling_ratios)
    out = jax.block_until_ready(out)
    assert out.shape == (B, out_features)
    print("KERNEL_OK")
</pallas_src>

<mosaic_0001>
module attributes {stable_mosaic.version = 11 : i64} {
  func.func @kernel(%arg0: i32, %arg1: memref<4xi32, #tpu.memory_space<smem>>, %arg2: memref<1x16x8xf32, #tpu.memory_space<vmem>>, %arg3: memref<1x16x16xf32, #tpu.memory_space<vmem>>, %arg4: memref<1x16x1xf32, #tpu.memory_space<vmem>>, %arg5: memref<8x32xf32, #tpu.memory_space<vmem>>, %arg6: memref<1x32xf32, #tpu.memory_space<vmem>>, %arg7: memref<32x32xf32, #tpu.memory_space<vmem>>, %arg8: memref<1x32xf32, #tpu.memory_space<vmem>>, %arg9: memref<32x32xf32, #tpu.memory_space<vmem>>, %arg10: memref<1x32xf32, #tpu.memory_space<vmem>>, %arg11: memref<1x32xf32, #tpu.memory_space<vmem>>, %arg12: memref<1x32xf32, #tpu.memory_space<vmem>>, %arg13: memref<32x4xf32, #tpu.memory_space<vmem>>, %arg14: memref<1x4xf32, #tpu.memory_space<vmem>>, %arg15: memref<1x1x4xf32, #tpu.memory_space<vmem>>) attributes {dimension_semantics = [#tpu.dimension_semantics<parallel>], iteration_bounds = array<i64: 2>, scalar_prefetch = 1 : i64, scratch_operands = 0 : i64, tpu.core_type = #tpu.core_type<tc>, window_params = [{transform_indices = @transform_0, window_bounds = array<i64: 1, 16, 8>}, {transform_indices = @transform_1, window_bounds = array<i64: 1, 16, 16>}, {transform_indices = @transform_2, window_bounds = array<i64: 1, 16, 1>}, {pipeline_mode = #tpu.pipeline_mode<synchronous>, transform_indices = @transform_3, window_bounds = array<i64: 8, 32>}, {pipeline_mode = #tpu.pipeline_mode<synchronous>, transform_indices = @transform_4, window_bounds = array<i64: 1, 32>}, {pipeline_mode = #tpu.pipeline_mode<synchronous>, transform_indices = @transform_5, window_bounds = array<i64: 32, 32>}, {pipeline_mode = #tpu.pipeline_mode<synchronous>, transform_indices = @transform_6, window_bounds = array<i64: 1, 32>}, {pipeline_mode = #tpu.pipeline_mode<synchronous>, transform_indices = @transform_7, window_bounds = array<i64: 32, 32>}, {pipeline_mode = #tpu.pipeline_mode<synchronous>, transform_indices = @transform_8, window_bounds = array<i64: 1, 32>}, {pipeline_mode = #tpu.pipeline_mode<synchronous>, transform_indices = @transform_9, window_bounds = array<i64: 1, 32>}, {pipeline_mode = #tpu.pipeline_mode<synchronous>, transform_indices = @transform_10, window_bounds = array<i64: 1, 32>}, {pipeline_mode = #tpu.pipeline_mode<synchronous>, transform_indices = @transform_11, window_bounds = array<i64: 32, 4>}, {pipeline_mode = #tpu.pipeline_mode<synchronous>, transform_indices = @transform_12, window_bounds = array<i64: 1, 4>}, {transform_indices = @transform_13, window_bounds = array<i64: 1, 1, 4>}]} {
    %c0 = arith.constant 0 : index
    %c0_0 = arith.constant 0 : index
    %c0_1 = arith.constant 0 : index
    %0 = vector.load %arg2[%c0, %c0_0, %c0_1] : memref<1x16x8xf32, #tpu.memory_space<vmem>>, vector<1x16x8xf32>
    %1 = vector.shape_cast %0 : vector<1x16x8xf32> to vector<16x8xf32>
    %c0_2 = arith.constant 0 : index
    %c0_3 = arith.constant 0 : index
    %c0_4 = arith.constant 0 : index
    %2 = vector.load %arg3[%c0_2, %c0_3, %c0_4] : memref<1x16x16xf32, #tpu.memory_space<vmem>>, vector<1x16x16xf32>
    %3 = vector.shape_cast %2 : vector<1x16x16xf32> to vector<16x16xf32>
    %c0_5 = arith.constant 0 : index
    %c0_6 = arith.constant 0 : index
    %c0_7 = arith.constant 0 : index
    %4 = vector.load %arg4[%c0_5, %c0_6, %c0_7] : memref<1x16x1xf32, #tpu.memory_space<vmem>>, vector<1x16x1xf32>
    %5 = vector.shape_cast %4 : vector<1x16x1xf32> to vector<16x1xf32>
    %6 = tpu.iota {dimensions = array<i32: 0>} : vector<16x16xi32>
    %7 = tpu.iota {dimensions = array<i32: 1>} : vector<16x16xi32>
    %8 = arith.cmpi eq, %6, %7 : vector<16x16xi32>
    %c0_8 = arith.constant 0 : index
    %c0_9 = arith.constant 0 : index
    %9 = vector.load %arg5[%c0_8, %c0_9] : memref<8x32xf32, #tpu.memory_space<vmem>>, vector<8x32xf32>
    %c0_10 = arith.constant 0 : index
    %c0_11 = arith.constant 0 : index
    %10 = vector.load %arg6[%c0_10, %c0_11] : memref<1x32xf32, #tpu.memory_space<vmem>>, vector<1x32xf32>
    %cst = arith.constant dense<0.000000e+00> : vector<16xf32>
    %11 = vector.multi_reduction <add>, %3, %cst [0] : vector<16x16xf32> to vector<16xf32>
    %12 = vector.shape_cast %11 : vector<16xf32> to vector<1x16xf32>
    %cst_12 = arith.constant 0.000000e+00 : f32
    %13 = vector.shape_cast %12 : vector<1x16xf32> to vector<1x16xf32>
    %14 = vector.broadcast %13 : vector<1x16xf32> to vector<16x16xf32>
    %15 = vector.broadcast %cst_12 : f32 to vector<16x16xf32>
    %16 = arith.select %8, %14, %15 : vector<16x16xi1>, vector<16x16xf32>
    %cst_13 = arith.constant dense<0.000000e+00> : vector<16xf32>
    %17 = vector.multi_reduction <add>, %16, %cst_13 [1] : vector<16x16xf32> to vector<16xf32>
    %18 = vector.shape_cast %17 : vector<16xf32> to vector<16x1xf32>
    %cst_14 = arith.constant 1.000000e+00 : f32
    %19 = vector.broadcast %cst_14 : f32 to vector<16x1xf32>
    %20 = arith.addf %18, %19 : vector<16x1xf32>
    %cst_15 = arith.constant 9.99999974E-6 : f32
    %21 = vector.broadcast %cst_15 : f32 to vector<16x1xf32>
    %22 = arith.addf %20, %21 : vector<16x1xf32>
    %23 = math.rsqrt %22 : vector<16x1xf32>
    %cst_16 = arith.constant dense<0.000000e+00> : vector<16x32xf32>
    %24 = tpu.matmul %1, %9, %cst_16 {dimension_numbers = #tpu.dot_dimension_numbers<[1], [0], [0], [1], [0, 0, 1, 1], [], []>} : vector<16x8xf32>, vector<8x32xf32>, vector<16x32xf32> -> vector<16x32xf32>
    %25 = vector.broadcast %23 : vector<16x1xf32> to vector<16x32xf32>
    %26 = arith.mulf %25, %24 : vector<16x32xf32>
    %cst_17 = arith.constant dense<0.000000e+00> : vector<16x32xf32>
    %27 = tpu.matmul %3, %26, %cst_17 {dimension_numbers = #tpu.dot_dimension_numbers<[1], [0], [0], [1], [0, 0, 1, 1], [], []>} : vector<16x16xf32>, vector<16x32xf32>, vector<16x32xf32> -> vector<16x32xf32>
    %28 = arith.addf %27, %26 : vector<16x32xf32>
    %29 = vector.broadcast %23 : vector<16x1xf32> to vector<16x32xf32>
    %30 = arith.mulf %29, %28 : vector<16x32xf32>
    %31 = vector.broadcast %10 : vector<1x32xf32> to vector<16x32xf32>
    %32 = arith.addf %30, %31 : vector<16x32xf32>
    %33 = vector.broadcast %5 : vector<16x1xf32> to vector<16x32xf32>
    %34 = arith.mulf %32, %33 : vector<16x32xf32>
    %cst_18 = arith.constant 0.000000e+00 : f32
    %35 = vector.broadcast %cst_18 : f32 to vector<16x32xf32>
    %36 = arith.maximumf %34, %35 : vector<16x32xf32>
    %c0_19 = arith.constant 0 : index
    %c0_20 = arith.constant 0 : index
    %37 = vector.load %arg11[%c0_19, %c0_20] : memref<1x32xf32, #tpu.memory_space<vmem>>, vector<1x32xf32>
    %38 = vector.broadcast %37 : vector<1x32xf32> to vector<16x32xf32>
    %39 = arith.mulf %36, %38 : vector<16x32xf32>
    %cst_21 = arith.constant dense<0.000000e+00> : vector<16xf32>
    %40 = vector.multi_reduction <add>, %39, %cst_21 [1] : vector<16x32xf32> to vector<16xf32>
    %41 = vector.shape_cast %40 : vector<16xf32> to vector<16x1xf32>
    %c2_i32 = arith.constant 2 : i32
    %42 = arith.muli %arg0, %c2_i32 : i32
    %c0_i32 = arith.constant 0 : i32
    %43 = arith.addi %42, %c0_i32 : i32
    %44 = arith.index_cast %43 : i32 to index
    %45 = memref.load %arg1[%44] : memref<4xi32, #tpu.memory_space<smem>>
    %46 = arith.sitofp %45 : i32 to f32
    %cst_22 = arith.constant 0.000000e+00 : f32
    %47 = vector.broadcast %cst_22 : f32 to vector<16x1xf32>
    %48 = arith.cmpf ogt, %5, %47 : vector<16x1xf32>
    %cst_23 = arith.constant 1.000000e+30 : f32
    %49 = vector.broadcast %cst_23 : f32 to vector<16x1xf32>
    %50 = arith.select %48, %41, %49 : vector<16x1xi1>, vector<16x1xf32>
    %cst_24 = arith.constant 0.000000e+00 : f32
    %51 = vector.shape_cast %50 : vector<16x1xf32> to vector<16x1xf32>
    %52 = vector.broadcast %51 : vector<16x1xf32> to vector<16x16xf32>
    %53 = vector.broadcast %cst_24 : f32 to vector<16x16xf32>
    %54 = arith.select %8, %52, %53 : vector<16x16xi1>, vector<16x16xf32>
    %cst_25 = arith.constant dense<0.000000e+00> : vector<16xf32>
    %55 = vector.multi_reduction <add>, %54, %cst_25 [0] : vector<16x16xf32> to vector<16xf32>
    %56 = vector.shape_cast %55 : vector<16xf32> to vector<1x16xf32>
    %57 = vector.broadcast %56 : vector<1x16xf32> to vector<16x16xf32>
    %58 = vector.broadcast %41 : vector<16x1xf32> to vector<16x16xf32>
    %59 = arith.cmpf olt, %57, %58 : vector<16x16xf32>
    %60 = vector.broadcast %56 : vector<1x16xf32> to vector<16x16xf32>
    %61 = vector.broadcast %41 : vector<16x1xf32> to vector<16x16xf32>
    %62 = arith.cmpf oeq, %60, %61 : vector<16x16xf32>
    %63 = arith.cmpi slt, %7, %6 : vector<16x16xi32>
    %64 = arith.andi %62, %63 : vector<16x16xi1>
    %65 = arith.ori %59, %64 : vector<16x16xi1>
    %cst_26 = arith.constant 1.000000e+00 : f32
    %cst_27 = arith.constant 0.000000e+00 : f32
    %66 = vector.broadcast %cst_26 : f32 to vector<16x16xf32>
    %67 = vector.broadcast %cst_27 : f32 to vector<16x16xf32>
    %68 = arith.select %65, %66, %67 : vector<16x16xi1>, vector<16x16xf32>
    %cst_28 = arith.constant dense<0.000000e+00> : vector<16xf32>
    %69 = vector.multi_reduction <add>, %68, %cst_28 [1] : vector<16x16xf32> to vector<16xf32>
    %70 = vector.shape_cast %69 : vector<16xf32> to vector<16x1xf32>
    %71 = vector.broadcast %46 : f32 to vector<16x1xf32>
    %72 = arith.cmpf oge, %70, %71 : vector<16x1xf32>
    %cst_29 = arith.constant 1.000000e+00 : f32
    %cst_30 = arith.constant 0.000000e+00 : f32
    %73 = vector.broadcast %cst_29 : f32 to vector<16x1xf32>
    %74 = vector.broadcast %cst_30 : f32 to vector<16x1xf32>
    %75 = arith.select %72, %73, %74 : vector<16x1xi1>, vector<16x1xf32>
    %76 = arith.mulf %5, %75 : vector<16x1xf32>
    %77 = math.tanh %41 : vector<16x1xf32>
    %78 = vector.broadcast %77 : vector<16x1xf32> to vector<16x32xf32>
    %79 = arith.mulf %36, %78 : vector<16x32xf32>
    %80 = vector.broadcast %76 : vector<16x1xf32> to vector<16x32xf32>
    %81 = arith.mulf %79, %80 : vector<16x32xf32>
    %c0_31 = arith.constant 0 : index
    %c0_32 = arith.constant 0 : index
    %82 = vector.load %arg7[%c0_31, %c0_32] : memref<32x32xf32, #tpu.memory_space<vmem>>, vector<32x32xf32>
    %c0_33 = arith.constant 0 : index
    %c0_34 = arith.constant 0 : index
    %83 = vector.load %arg8[%c0_33, %c0_34] : memref<1x32xf32, #tpu.memory_space<vmem>>, vector<1x32xf32>
    %84 = vector.broadcast %76 : vector<16x1xf32> to vector<16x16xf32>
    %85 = arith.mulf %84, %3 : vector<16x16xf32>
    %cst_35 = arith.constant dense<0.000000e+00> : vector<16xf32>
    %86 = vector.multi_reduction <add>, %85, %cst_35 [0] : vector<16x16xf32> to vector<16xf32>
    %87 = vector.shape_cast %86 : vector<16xf32> to vector<1x16xf32>
    %cst_36 = arith.constant 0.000000e+00 : f32
    %88 = vector.shape_cast %87 : vector<1x16xf32> to vector<1x16xf32>
    %89 = vector.broadcast %88 : vector<1x16xf32> to vector<16x16xf32>
    %90 = vector.broadcast %cst_36 : f32 to vector<16x16xf32>
    %91 = arith.select %8, %89, %90 : vector<16x16xi1>, vector<16x16xf32>
    %cst_37 = arith.constant dense<0.000000e+00> : vector<16xf32>
    %92 = vector.multi_reduction <add>, %91, %cst_37 [1] : vector<16x16xf32> to vector<16xf32>
    %93 = vector.shape_cast %92 : vector<16xf32> to vector<16x1xf32>
    %94 = arith.mulf %93, %76 : vector<16x1xf32>
    %cst_38 = arith.constant 1.000000e+00 : f32
    %95 = vector.broadcast %cst_38 : f32 to vector<16x1xf32>
    %96 = arith.addf %94, %95 : vector<16x1xf32>
    %cst_39 = arith.constant 9.99999974E-6 : f32
    %97 = vector.broadcast %cst_39 : f32 to vector<16x1xf32>
    %98 = arith.addf %96, %97 : vector<16x1xf32>
    %99 = math.rsqrt %98 : vector<16x1xf32>
    %cst_40 = arith.constant dense<0.000000e+00> : vector<16x32xf32>
    %100 = tpu.matmul %81, %82, %cst_40 {dimension_numbers = #tpu.dot_dimension_numbers<[1], [0], [0], [1], [0, 0, 1, 1], [], []>} : vector<16x32xf32>, vector<32x32xf32>, vector<16x32xf32> -> vector<16x32xf32>
    %101 = vector.broadcast %99 : vector<16x1xf32> to vector<16x32xf32>
    %102 = arith.mulf %101, %100 : vector<16x32xf32>
    %103 = vector.broadcast %76 : vector<16x1xf32> to vector<16x32xf32>
    %104 = arith.mulf %103, %102 : vector<16x32xf32>
    %cst_41 = arith.constant dense<0.000000e+00> : vector<16x32xf32>
    %105 = tpu.matmul %85, %104, %cst_41 {dimension_numbers = #tpu.dot_dimension_numbers<[1], [0], [0], [1], [0, 0, 1, 1], [], []>} : vector<16x16xf32>, vector<16x32xf32>, vector<16x32xf32> -> vector<16x32xf32>
    %106 = arith.addf %105, %102 : vector<16x32xf32>
    %107 = vector.broadcast %99 : vector<16x1xf32> to vector<16x32xf32>
    %108 = arith.mulf %107, %106 : vector<16x32xf32>
    %109 = vector.broadcast %83 : vector<1x32xf32> to vector<16x32xf32>
    %110 = arith.addf %108, %109 : vector<16x32xf32>
    %111 = vector.broadcast %76 : vector<16x1xf32> to vector<16x32xf32>
    %112 = arith.mulf %110, %111 : vector<16x32xf32>
    %cst_42 = arith.constant 0.000000e+00 : f32
    %113 = vector.broadcast %cst_42 : f32 to vector<16x32xf32>
    %114 = arith.maximumf %112, %113 : vector<16x32xf32>
    %c0_43 = arith.constant 0 : index
    %c0_44 = arith.constant 0 : index
    %115 = vector.load %arg12[%c0_43, %c0_44] : memref<1x32xf32, #tpu.memory_space<vmem>>, vector<1x32xf32>
    %116 = vector.broadcast %115 : vector<1x32xf32> to vector<16x32xf32>
    %117 = arith.mulf %114, %116 : vector<16x32xf32>
    %cst_45 = arith.constant dense<0.000000e+00> : vector<16xf32>
    %118 = vector.multi_reduction <add>, %117, %cst_45 [1] : vector<16x32xf32> to vector<16xf32>
    %119 = vector.shape_cast %118 : vector<16xf32> to vector<16x1xf32>
    %c2_i32_46 = arith.constant 2 : i32
    %120 = arith.muli %arg0, %c2_i32_46 : i32
    %c1_i32 = arith.constant 1 : i32
    %121 = arith.addi %120, %c1_i32 : i32
    %122 = arith.index_cast %121 : i32 to index
    %123 = memref.load %arg1[%122] : memref<4xi32, #tpu.memory_space<smem>>
    %124 = arith.sitofp %123 : i32 to f32
    %cst_47 = arith.constant 0.000000e+00 : f32
    %125 = vector.broadcast %cst_47 : f32 to vector<16x1xf32>
    %126 = arith.cmpf ogt, %76, %125 : vector<16x1xf32>
    %cst_48 = arith.constant 1.000000e+30 : f32
    %127 = vector.broadcast %cst_48 : f32 to vector<16x1xf32>
    %128 = arith.select %126, %119, %127 : vector<16x1xi1>, vector<16x1xf32>
    %cst_49 = arith.constant 0.000000e+00 : f32
    %129 = vector.shape_cast %128 : vector<16x1xf32> to vector<16x1xf32>
    %130 = vector.broadcast %129 : vector<16x1xf32> to vector<16x16xf32>
    %131 = vector.broadcast %cst_49 : f32 to vector<16x16xf32>
    %132 = arith.select %8, %130, %131 : vector<16x16xi1>, vector<16x16xf32>
    %cst_50 = arith.constant dense<0.000000e+00> : vector<16xf32>
    %133 = vector.multi_reduction <add>, %132, %cst_50 [0] : vector<16x16xf32> to vector<16xf32>
    %134 = vector.shape_cast %133 : vector<16xf32> to vector<1x16xf32>
    %135 = vector.broadcast %134 : vector<1x16xf32> to vector<16x16xf32>
    %136 = vector.broadcast %119 : vector<16x1xf32> to vector<16x16xf32>
    %137 = arith.cmpf olt, %135, %136 : vector<16x16xf32>
    %138 = vector.broadcast %134 : vector<1x16xf32> to vector<16x16xf32>
    %139 = vector.broadcast %119 : vector<16x1xf32> to vector<16x16xf32>
    %140 = arith.cmpf oeq, %138, %139 : vector<16x16xf32>
    %141 = arith.cmpi slt, %7, %6 : vector<16x16xi32>
    %142 = arith.andi %140, %141 : vector<16x16xi1>
    %143 = arith.ori %137, %142 : vector<16x16xi1>
    %cst_51 = arith.constant 1.000000e+00 : f32
    %cst_52 = arith.constant 0.000000e+00 : f32
    %144 = vector.broadcast %cst_51 : f32 to vector<16x16xf32>
    %145 = vector.broadcast %cst_52 : f32 to vector<16x16xf32>
    %146 = arith.select %143, %144, %145 : vector<16x16xi1>, vector<16x16xf32>
    %cst_53 = arith.constant dense<0.000000e+00> : vector<16xf32>
    %147 = vector.multi_reduction <add>, %146, %cst_53 [1] : vector<16x16xf32> to vector<16xf32>
    %148 = vector.shape_cast %147 : vector<16xf32> to vector<16x1xf32>
    %149 = vector.broadcast %124 : f32 to vector<16x1xf32>
    %150 = arith.cmpf oge, %148, %149 : vector<16x1xf32>
    %cst_54 = arith.constant 1.000000e+00 : f32
    %cst_55 = arith.constant 0.000000e+00 : f32
    %151 = vector.broadcast %cst_54 : f32 to vector<16x1xf32>
    %152 = vector.broadcast %cst_55 : f32 to vector<16x1xf32>
    %153 = arith.select %150, %151, %152 : vector<16x1xi1>, vector<16x1xf32>
    %154 = arith.mulf %76, %153 : vector<16x1xf32>
    %155 = math.tanh %119 : vector<16x1xf32>
    %156 = vector.broadcast %155 : vector<16x1xf32> to vector<16x32xf32>
    %157 = arith.mulf %114, %156 : vector<16x32xf32>
    %158 = vector.broadcast %154 : vector<16x1xf32> to vector<16x32xf32>
    %159 = arith.mulf %157, %158 : vector<16x32xf32>
    %c0_56 = arith.constant 0 : index
    %c0_57 = arith.constant 0 : index
    %160 = vector.load %arg9[%c0_56, %c0_57] : memref<32x32xf32, #tpu.memory_space<vmem>>, vector<32x32xf32>
    %c0_58 = arith.constant 0 : index
    %c0_59 = arith.constant 0 : index
    %161 = vector.load %arg10[%c0_58, %c0_59] : memref<1x32xf32, #tpu.memory_space<vmem>>, vector<1x32xf32>
    %162 = vector.broadcast %154 : vector<16x1xf32> to vector<16x16xf32>
    %163 = arith.mulf %162, %3 : vector<16x16xf32>
    %cst_60 = arith.constant dense<0.000000e+00> : vector<16xf32>
    %164 = vector.multi_reduction <add>, %163, %cst_60 [0] : vector<16x16xf32> to vector<16xf32>
    %165 = vector.shape_cast %164 : vector<16xf32> to vector<1x16xf32>
    %cst_61 = arith.constant 0.000000e+00 : f32
    %166 = vector.shape_cast %165 : vector<1x16xf32> to vector<1x16xf32>
    %167 = vector.broadcast %166 : vector<1x16xf32> to vector<16x16xf32>
    %168 = vector.broadcast %cst_61 : f32 to vector<16x16xf32>
    %169 = arith.select %8, %167, %168 : vector<16x16xi1>, vector<16x16xf32>
    %cst_62 = arith.constant dense<0.000000e+00> : vector<16xf32>
    %170 = vector.multi_reduction <add>, %169, %cst_62 [1] : vector<16x16xf32> to vector<16xf32>
    %171 = vector.shape_cast %170 : vector<16xf32> to vector<16x1xf32>
    %172 = arith.mulf %171, %154 : vector<16x1xf32>
    %cst_63 = arith.constant 1.000000e+00 : f32
    %173 = vector.broadcast %cst_63 : f32 to vector<16x1xf32>
    %174 = arith.addf %172, %173 : vector<16x1xf32>
    %cst_64 = arith.constant 9.99999974E-6 : f32
    %175 = vector.broadcast %cst_64 : f32 to vector<16x1xf32>
    %176 = arith.addf %174, %175 : vector<16x1xf32>
    %177 = math.rsqrt %176 : vector<16x1xf32>
    %cst_65 = arith.constant dense<0.000000e+00> : vector<16x32xf32>
    %178 = tpu.matmul %159, %160, %cst_65 {dimension_numbers = #tpu.dot_dimension_numbers<[1], [0], [0], [1], [0, 0, 1, 1], [], []>} : vector<16x32xf32>, vector<32x32xf32>, vector<16x32xf32> -> vector<16x32xf32>
    %179 = vector.broadcast %177 : vector<16x1xf32> to vector<16x32xf32>
    %180 = arith.mulf %179, %178 : vector<16x32xf32>
    %181 = vector.broadcast %154 : vector<16x1xf32> to vector<16x32xf32>
    %182 = arith.mulf %181, %180 : vector<16x32xf32>
    %cst_66 = arith.constant dense<0.000000e+00> : vector<16x32xf32>
    %183 = tpu.matmul %163, %182, %cst_66 {dimension_numbers = #tpu.dot_dimension_numbers<[1], [0], [0], [1], [0, 0, 1, 1], [], []>} : vector<16x16xf32>, vector<16x32xf32>, vector<16x32xf32> -> vector<16x32xf32>
    %184 = arith.addf %183, %180 : vector<16x32xf32>
    %185 = vector.broadcast %177 : vector<16x1xf32> to vector<16x32xf32>
    %186 = arith.mulf %185, %184 : vector<16x32xf32>
    %187 = vector.broadcast %161 : vector<1x32xf32> to vector<16x32xf32>
    %188 = arith.addf %186, %187 : vector<16x32xf32>
    %189 = vector.broadcast %154 : vector<16x1xf32> to vector<16x32xf32>
    %190 = arith.mulf %188, %189 : vector<16x32xf32>
    %cst_67 = arith.constant 0.000000e+00 : f32
    %191 = vector.broadcast %cst_67 : f32 to vector<16x32xf32>
    %192 = arith.maximumf %190, %191 : vector<16x32xf32>
    %cst_68 = arith.constant dense<0xFF800000> : vector<32xf32>
    %193 = vector.multi_reduction <maximumf>, %192, %cst_68 [0] : vector<16x32xf32> to vector<32xf32>
    %194 = vector.shape_cast %193 : vector<32xf32> to vector<1x32xf32>
    %c0_69 = arith.constant 0 : index
    %c0_70 = arith.constant 0 : index
    %195 = vector.load %arg13[%c0_69, %c0_70] : memref<32x4xf32, #tpu.memory_space<vmem>>, vector<32x4xf32>
    %cst_71 = arith.constant dense<0.000000e+00> : vector<1x4xf32>
    %196 = tpu.matmul %194, %195, %cst_71 {dimension_numbers = #tpu.dot_dimension_numbers<[1], [0], [0], [1], [0, 0, 1, 1], [], []>} : vector<1x32xf32>, vector<32x4xf32>, vector<1x4xf32> -> vector<1x4xf32>
    %c0_72 = arith.constant 0 : index
    %c0_73 = arith.constant 0 : index
    %197 = vector.load %arg14[%c0_72, %c0_73] : memref<1x4xf32, #tpu.memory_space<vmem>>, vector<1x4xf32>
    %198 = arith.addf %196, %197 : vector<1x4xf32>
    %c0_74 = arith.constant 0 : index
    %c0_75 = arith.constant 0 : index
    %c0_76 = arith.constant 0 : index
    %199 = vector.load %arg15[%c0_74, %c0_75, %c0_76] : memref<1x1x4xf32, #tpu.memory_space<vmem>>, vector<1x1x4xf32>
    %200 = vector.shape_cast %199 : vector<1x1x4xf32> to vector<1x4xf32>
    %201 = vector.shape_cast %198 : vector<1x4xf32> to vector<1x1x4xf32>
    tpu.vector_store %arg15[%c0_74, %c0_75, %c0_76], %201 {strides = array<i32>} : memref<1x1x4xf32, #tpu.memory_space<vmem>>, vector<1x1x4xf32>,
    return
  }
  func.func @transform_0(%arg0: i32, %arg1: memref<4xi32, #tpu.memory_space<smem>>) -> (i32, i32, i32) {
    %c0_i32 = arith.constant 0 : i32
    %c0_i32_0 = arith.constant 0 : i32
    %c0_i32_1 = arith.constant 0 : i32
    return %arg0, %c0_i32, %c0_i32_0 : i32, i32, i32
  }
  func.func @transform_1(%arg0: i32, %arg1: memref<4xi32, #tpu.memory_space<smem>>) -> (i32, i32, i32) {
    %c0_i32 = arith.constant 0 : i32
    %c0_i32_0 = arith.constant 0 : i32
    %c0_i32_1 = arith.constant 0 : i32
    return %arg0, %c0_i32, %c0_i32_0 : i32, i32, i32
  }
  func.func @transform_2(%arg0: i32, %arg1: memref<4xi32, #tpu.memory_space<smem>>) -> (i32, i32, i32) {
    %c0_i32 = arith.constant 0 : i32
    %c0_i32_0 = arith.constant 0 : i32
    %c0_i32_1 = arith.constant 0 : i32
    return %arg0, %c0_i32, %c0_i32_0 : i32, i32, i32
  }
  func.func @transform_3(%arg0: i32, %arg1: memref<4xi32, #tpu.memory_space<smem>>) -> (i32, i32) {
    %c0_i32 = arith.constant 0 : i32
    %c0_i32_0 = arith.constant 0 : i32
    %c0_i32_1 = arith.constant 0 : i32
    return %c0_i32, %c0_i32_0 : i32, i32
  }
  func.func @transform_4(%arg0: i32, %arg1: memref<4xi32, #tpu.memory_space<smem>>) -> (i32, i32) {
    %c0_i32 = arith.constant 0 : i32
    %c0_i32_0 = arith.constant 0 : i32
    %c0_i32_1 = arith.constant 0 : i32
    return %c0_i32, %c0_i32_0 : i32, i32
  }
  func.func @transform_5(%arg0: i32, %arg1: memref<4xi32, #tpu.memory_space<smem>>) -> (i32, i32) {
    %c0_i32 = arith.constant 0 : i32
    %c0_i32_0 = arith.constant 0 : i32
    %c0_i32_1 = arith.constant 0 : i32
    return %c0_i32, %c0_i32_0 : i32, i32
  }
  func.func @transform_6(%arg0: i32, %arg1: memref<4xi32, #tpu.memory_space<smem>>) -> (i32, i32) {
    %c0_i32 = arith.constant 0 : i32
    %c0_i32_0 = arith.constant 0 : i32
    %c0_i32_1 = arith.constant 0 : i32
    return %c0_i32, %c0_i32_0 : i32, i32
  }
  func.func @transform_7(%arg0: i32, %arg1: memref<4xi32, #tpu.memory_space<smem>>) -> (i32, i32) {
    %c0_i32 = arith.constant 0 : i32
    %c0_i32_0 = arith.constant 0 : i32
    %c0_i32_1 = arith.constant 0 : i32
    return %c0_i32, %c0_i32_0 : i32, i32
  }
  func.func @transform_8(%arg0: i32, %arg1: memref<4xi32, #tpu.memory_space<smem>>) -> (i32, i32) {
    %c0_i32 = arith.constant 0 : i32
    %c0_i32_0 = arith.constant 0 : i32
    %c0_i32_1 = arith.constant 0 : i32
    return %c0_i32, %c0_i32_0 : i32, i32
  }
  func.func @transform_9(%arg0: i32, %arg1: memref<4xi32, #tpu.memory_space<smem>>) -> (i32, i32) {
    %c0_i32 = arith.constant 0 : i32
    %c0_i32_0 = arith.constant 0 : i32
    %c0_i32_1 = arith.constant 0 : i32
    return %c0_i32, %c0_i32_0 : i32, i32
  }
  func.func @transform_10(%arg0: i32, %arg1: memref<4xi32, #tpu.memory_space<smem>>) -> (i32, i32) {
    %c0_i32 = arith.constant 0 : i32
    %c0_i32_0 = arith.constant 0 : i32
    %c0_i32_1 = arith.constant 0 : i32
    return %c0_i32, %c0_i32_0 : i32, i32
  }
  func.func @transform_11(%arg0: i32, %arg1: memref<4xi32, #tpu.memory_space<smem>>) -> (i32, i32) {
    %c0_i32 = arith.constant 0 : i32
    %c0_i32_0 = arith.constant 0 : i32
    %c0_i32_1 = arith.constant 0 : i32
    return %c0_i32, %c0_i32_0 : i32, i32
  }
  func.func @transform_12(%arg0: i32, %arg1: memref<4xi32, #tpu.memory_space<smem>>) -> (i32, i32) {
    %c0_i32 = arith.constant 0 : i32
    %c0_i32_0 = arith.constant 0 : i32
    %c0_i32_1 = arith.constant 0 : i32
    return %c0_i32, %c0_i32_0 : i32, i32
  }
  func.func @transform_13(%arg0: i32, %arg1: memref<4xi32, #tpu.memory_space<smem>>) -> (i32, i32, i32) {
    %c0_i32 = arith.constant 0 : i32
    %c0_i32_0 = arith.constant 0 : i32
    %c0_i32_1 = arith.constant 0 : i32
    return %arg0, %c0_i32, %c0_i32_0 : i32, i32, i32
  }
}

</mosaic_0001>

<bundles_post_ra>
// kernel: tpu_custom_call.1
= control target key start
LH: loop header
LB: loop body
LE: loop exit
PB: predicated region body
PF: predicated region fallthrough
CT: control target
= control target key end

     0   :  { %s1363_s16 = smov [#allocation3]   ;;  %s1802_s0 = inlined_call_operand.vmem [shape: s32[4], index: 0, kind: input, shape index: {}]   ;;  %s1803_s1 = inlined_call_operand.vmem [shape: f32[2,16,8], index: 1, kind: input, shape index: {}]   ;;  %s1804_s2 = inlined_call_operand.vmem [shape: f32[2,16,16], index: 2, kind: input, shape index: {}]   ;;  %s1805_s3 = inlined_call_operand.vmem [shape: f32[2,16,1], index: 3, kind: input, shape index: {}]   ;;  %s1806_s4 = inlined_call_operand.vmem [shape: f32[8,32], index: 4, kind: input, shape index: {}]   ;;  %s1807_s5 = inlined_call_operand.vmem [shape: f32[1,32], index: 5, kind: input, shape index: {}]   ;;  %s1808_s6 = inlined_call_operand.vmem [shape: f32[32,32], index: 6, kind: input, shape index: {}]   ;;  %s1809_s7 = inlined_call_operand.vmem [shape: f32[1,32], index: 7, kind: input, shape index: {}]   ;;  %s1810_s8 = inlined_call_operand.vmem [shape: f32[32,32], index: 8, kind: input, shape index: {}]   ;;  %s1811_s9 = inlined_call_operand.vmem [shape: f32[1,32], index: 9, kind: input, shape index: {}]   ;;  %s1812_s10 = inlined_call_operand.vmem [shape: f32[1,32], index: 10, kind: input, shape index: {}]   ;;  %s1813_s11 = inlined_call_operand.vmem [shape: f32[1,32], index: 11, kind: input, shape index: {}]   ;;  %s1814_s12 = inlined_call_operand.vmem [shape: f32[32,4], index: 12, kind: input, shape index: {}]   ;;  %s1815_s13 = inlined_call_operand.vmem [shape: f32[1,4], index: 13, kind: input, shape index: {}]   ;;  %s1816_s14 = inlined_call_operand.hbm [shape: f32[2,1,4], index: 14, kind: output, shape index: {}]  }
   0x1   :  { %1818 = sst [smem:[#allocation10_spill]] %s1803_s1  ;;  %s20_s15 = sshll.u32 %s1802_s0, 4  ;;  %s21_s15 = int_to_ptr.vmem [resolvable:$true] %s20_s15 }
   0x2   :  { %1819 = sst [smem:[#allocation11_spill]] %s1804_s2 }
   0x3   :  { %23 = dma.vmem_to_smem %s21_s15, 16, %s1363_s16, [#allocation2] }
   0x4   :  { %1341 = dma.done.wait [#allocation2], 16 }
   0x5   :  { %1342 = vsyncadd [#allocation2], 4294967280 }
   0x6   :  { %26 = sfence }
   0x7   :  { %27 = vsyncpa [#allocation5], 0 }
   0x8   :  { %29 = vsyncpa [#allocation5 + $0x1], 0  ;;  %s1444_s17 = smov 0   ;;  %s1446_s18 = smov 0  }
   0x9   :  { %s1448_s19 = smov 0   ;;  %s1450_s20 = smov 0  }
   0xa LB: > { %1820 = sst [smem:[#allocation8_spill]] %s1357_s19  ;;  %s1465_s0 = sadd.s32 4294967295, %s1361_s20   ;;  %s1361_s20 = sphi %s1450_s20, %s1834_s20   ;;  %s1357_s19 = sphi %s1448_s19, %s1831_s19   ;;  %s1353_s18 = sphi %s1446_s18, %s1833_s18   ;;  %s1349_s17 = sphi %s1444_s17, %s1832_s17  }
   0xb   : > { %s1184_s21 = sadd.s32 4294967294, %s1361_s20   ;;  %s1469_s22 = sadd.s32 1, %s1361_s20  }
   0xc   : > { %s330_s23 = sadd.s32 1, %s1357_s19  ;;  %s327_s24 = ssub.s32 %s1361_s20, %s1469_s22 }
   0xd   : > { %p340_p0 = scmp.ne.s32.totalorder %s1357_s19, %s1353_s18  ;;  %p328_p1 = scmp.eq.s32.totalorder %s327_s24, 0 }
   0xe   : > { %p341_p2 = scmp.eq.s32.totalorder %s1465_s0, 1  ;;  %p346_p3 = scmp.ne.s32.totalorder %s1353_s18, %s1349_s17 }
   0xf   : > { %p347_p4 = scmp.eq.s32.totalorder %s1184_s21, 1  ;;  %p1187_p7 = scmp.ge.s32.totalorder %s1361_s20, 1 }
  0x10   : > { %s1480_s25 = scalar_select %p328_p1, %s1357_s19, %s330_s23  }
  0x11   : > { %p1482_p5 = por %p341_p2, %p340_p0  ;;  %p1486_p6 = por %p347_p4, %p346_p3 }
  0x12   : > { %1821 = sst [smem:[#allocation9_spill]] %s1480_s25  ;;  %p419_p8 = scmp.lt.s32.totalorder %s1361_s20, 3 }
  0x14   : > { %p420_p9 = pnand %p1187_p7, %p419_p8 }
  0x15   : > { %p472_p10 = scmp.lt.s32.totalorder (!%p420_p9), %s1465_s0, 1  ;;  %s1824_s2 = sld [smem:[#allocation11_spill]] (!%p420_p9) }
  0x16   : > { %423 = sbr.rel (%p420_p9) target bundleno = 2324 (0x914), region = 72  ;;  %s1825_s1 = sld [smem:[#allocation10_spill]] (!%p420_p9) }
  0x17   : > { %s1198_s25 = sshll.u32 (!%p420_p9), %s1465_s0, 1  ;;  %s1101_s21 = scalar_lea.hbm (!%p420_p9), %s1816_s14, %s1465_s0 }
  0x18   : > { %s853_s29 = sadd.s32 (!%p420_p9), 1, %s1198_s25  ;;  %s1317_s16 = scalar_lea.hbm (!%p420_p9), %s1816_s14, 2 }
  0x1b   : > { %v500_v0 = vld [vmem:[%s1806_s4] sm:$0xff]  ;;  %s473_s30 = scalar_select %p472_p10, %s1465_s0, 1  ;;  %vm502_vm0 = vcmask 130048   ;;  %vm544_vm1 = vcmask 64512   ;;  %v493_v4 = vlaneseq  ;;  %v1364_v28 = vmov 0  }
  0x1c   : > { %566 = vmatpush.msra.mxu0 %v500_v0  ;;  %1257 = vset.pattern.permute.xlu1 %v1364_v28  ;;  %v1260_v53 = vld [vmem:[%s1807_s5] ss:$0 sm:$0xff]  ;;  %vm632_vm10 = vcmask 261120  }
  0x1d   : > { %s1497_s15 = sshll.u32 %s473_s30, 4  ;;  %v1516_v9 = vshrl.u32 %v493_v4, 7  ;;  %v1521_v14 = vand.u32 127, %v493_v4  ;;  %1258 = vset.pattern.permute.xlu0 %v1364_v28  ;;  %1259 = vset.pattern.permute.xlu2 %v1364_v28  ;;  %v1261_v60 = vld [vmem:[%s1812_s10] ss:$0 sm:$0xff]  ;;  %s640_s30 = sld [smem:[#allocation3 + %s1198_s25]] }
  0x1e   : > { %s481_s23 = scalar_lea.vmem %s1824_s2, %s1497_s15  ;;  %s476_s19 = scalar_lea.vmem %s1825_s1, %s1497_s15 }
  0x1f   : > { %v1507_v1 = vld [vmem:[%s481_s23] sm:$0xff]  ;;  %v1509_v2 = vld [vmem:[%s481_s23 + $0x8] sm:$0xff]  ;;  %v1519_v13 = vadd.s32 8, %v1516_v9  ;;  %vm1535_vm3 = vcmp.eq.s32.totalorder %v1516_v9, %v1521_v14  ;;  %s486_s28 = scalar_lea.vmem %s1805_s3, %s1497_s15  ;;  %vm671_vm14 = vcmp.lt.s32.totalorder %v1521_v14, %v1516_v9 }
  0x20   : > { %v487_v3 = vld [vmem:[%s476_s19] sm:$0xff]  ;;  %v503_v5 = vsel %vm502_vm0, %v1507_v1, 0.0  ;;  %v504_v6 = vsel %vm502_vm0, %v1509_v2, 0.0  ;;  %v488_v11 = vld [vmem:[%s476_s19 + $0x8] sm:$0xff] }
  0x21   : > { %1194 = vmatmul.msk.f32.vlgmr.msra.gmra.mxu0 %vm544_vm1, %v487_v3  ;;  %v505_v7 = vadd.f32 %v504_v6, %v503_v5  ;;  %vm1526_vm2 = vcmp.eq.s32.totalorder %v1519_v13, %v1521_v14  ;;  %v1546_v26 = vld [vmem:[%s486_s28] sm:$0xff]  ;;  %v1549_v31 = vld [vmem:[%s486_s28 + $0x8] sm:$0xff]  ;;  %vm672_vm13 = vcmp.lt.s32.totalorder %v1521_v14, %v1519_v13  ;;  %s1105_s28 = sshll.u32 %s1101_s21, 4  ;;  %s1106_s28 = int_to_ptr.hbm [resolvable:$true] %s1105_s28 }
  0x22   : > { %614 = vperm.xlu1 %1257, %v1546_v26   ;;  %vm642_vm11 = vcmp.gt.f32.partialorder %v1546_v26, 0.0  ;;  %vm643_vm12 = vcmp.gt.f32.partialorder %v1549_v31, 0.0  ;;  %s1311_s1 = sshra.s32 %s1106_s28, 4  ;;  %s1312_s1 = int_to_ptr.hbm [resolvable:$true] %s1311_s1 }
  0x23   : > { %v506_v8 = vrot.slane %v505_v7, 4  ;;  %s641_s15 = scvt.s32.f32 %s640_s30  ;;  %s854_s30 = sld [smem:[#allocation3 + %s853_s29]] }
  0x24   : > { %s1313_s2 = scalar_lea.hbm %s1312_s1, 1  ;;  %p1318_p0 = scmp.lt.s32.totalorder %s1312_s1, %s1816_s14 }
  0x25   : > { %v507_v10 = vadd.f32 %v506_v8, %v505_v7  ;;  %p1314_p11 = scmp.ne.s32.totalorder %s1312_s1, %s1313_s2  ;;  %p1319_p1 = scmp.lt.s32.totalorder %s1317_s16, %s1313_s2 }
  0x27   : > { %v508_v12 = vrot.slane %v507_v10, 2  ;;  %p1315_p12 = pnand %p1314_p11, %p1482_p5  ;;  %p1320_p2 = por %p1319_p1, %p1318_p0 }
  0x29   : > { %1195 = vmatmul.msk.f32.gmra.mxu0 %vm544_vm1, %v488_v11  ;;  %v509_v15 = vadd.f32 %v508_v12, %v507_v10  ;;  %p1316_p13 = pneg %p1315_p12 }
  0x2a   : > { %619 = vperm.xlu1 %1257, %v1549_v31  }
  0x2b   : > { %v510_v16 = vrot.slane %v509_v15, 1  ;;  %p1321_p3 = pnand %p1320_p2, %p1316_p13 }
  0x2d   : > { %v511_v18 = vadd.f32 %v510_v16, %v509_v15 }
  0x2f   : > { %v513_v19 = vsel %vm1526_vm2, %v511_v18, 0.0  ;;  %v512_v22 = vsel %vm1535_vm3, %v511_v18, 0.0 }
  0x30   : > { %v517_v20 = vsel %vm502_vm0, %v513_v19, 0.0  ;;  %v514_v23 = vsel %vm502_vm0, %v512_v22, 0.0 }
  0x31   : > { %518 = vadd.xlane.f32.xlu0 %v517_v20 }
  0x39   : > { %515 = vadd.xlane.f32.xlu0 %v514_v23 }
  0x94   : > { %v615_v54 = vpop.permute.xlu1 %614 }
  0x9c   : > { %v620_v3 = vpop.permute.xlu1 %619 }
  0x9e   : > { %v568_v32 = vpop.f32.mrf.mxu0 }
  0xa4   : > { %v519_v24 = vpop.xlane.xlu0 %518 }
  0xa5   : > { %v521_v25 = vadd.f32 1.0, %v519_v24 }
  0xa6   : > { %v571_v42 = vpop.f32.mrf.mxu0 }
  0xa7   : > { %v523_v27 = vadd.f32 1e-05, %v521_v25 }
  0xa9   : > { %1265 = vrsqrt.f32 %v523_v27  ;;  %vm540_vm5 = vweird.f32 %v523_v27 }
  0xac   : > { %v516_v29 = vpop.xlane.xlu0 %515 }
  0xad   : > { %v520_v30 = vadd.f32 1.0, %v516_v29 }
  0xaf   : > { %v1266_v33 = vpop.eup %1265  ;;  %v522_v34 = vadd.f32 1e-05, %v520_v30 }
  0xb0   : > { %v535_v35 = vmul.f32 %v1266_v33, %v523_v27  ;;  %vm541_vm4 = vweird.f32 %v1266_v33 }
  0xb1   : > { %1267 = vrsqrt.f32 %v522_v34  ;;  %vm542_vm6 = vmor %vm540_vm5, %vm541_vm4  ;;  %vm530_vm8 = vweird.f32 %v522_v34 }
  0xb2   : > { %v536_v36 = vmul.f32 %v1266_v33, %v535_v35 }
  0xb4   : > { %v537_v37 = vmul.f32 0.5, %v536_v36 }
  0xb6   : > { %v538_v38 = vsub.f32 1.5, %v537_v37 }
  0xb7   : > { %v1268_v39 = vpop.eup %1267 }
  0xb8   : > { %v525_v40 = vmul.f32 %v1268_v39, %v522_v34  ;;  %v539_v41 = vmul.f32 %v1266_v33, %v538_v38  ;;  %vm531_vm7 = vweird.f32 %v1268_v39  ;;  %v711_v38 = vld [vmem:[%s1808_s6 + $0x18] sm:$0xff] }
  0xb9   : > { %vm532_vm9 = vmor %vm530_vm8, %vm531_vm7 }
  0xba   : > { %v526_v43 = vmul.f32 %v1268_v39, %v525_v40  ;;  %v543_v44 = vsel %vm542_vm6, %v1266_v33, %v539_v41  ;;  %v1365_v33 = vmov 0.0   ;;  %v709_v40 = vld [vmem:[%s1808_s6 + $0x8] sm:$0xff]  ;;  %v685_v41 = vstv %s641_s15  ;;  %s855_s15 = scvt.s32.f32 %s854_s30  ;;  %s470_s30 = sand.u32 1, %s1353_s18  }
  0xbb   : > { %v575_v45 = vmul.f32 %v571_v42, %v543_v44  ;;  %s471_s24 = scalar_lea.vmem [#allocation4], %s470_s30  ;;  %s1093_s29 = scalar_lea.sflag [#allocation5], %s470_s30 }
  0xbc   : > { %v527_v46 = vmul.f32 0.5, %v526_v43  ;;  %v897_v13 = vstv %s855_s15  ;;  %s1103_s19 = sshll.u32 %s471_s24, 4  ;;  %s1104_s19 = int_to_ptr.vmem [resolvable:$true] %s1103_s19 }
  0xbd   : > { %596 = vmatpush.msra.mxu1 %v575_v45  ;;  %1213 = vmatpush.msra.mxu2 %v575_v45 }
  0xbe   : > { %v528_v47 = vsub.f32 1.5, %v527_v46 }
  0xc0   : > { %v529_v48 = vmul.f32 %v1268_v39, %v528_v47 }
  0xc2   : > { %v533_v49 = vsel %vm532_vm9, %v1268_v39, %v529_v48  ;;  %v710_v39 = vld [vmem:[%s1808_s6 + $0x10] sm:$0xff]  ;;  %v708_v48 = vld [vmem:[%s1808_s6] sm:$0xff] }
  0xc3   : > { %v574_v50 = vmul.f32 %v568_v32, %v533_v49 }
  0xc5   : > { %597 = vmatpush.msra.mxu1 %v574_v50  ;;  %1214 = vmatpush.msra.mxu2 %v574_v50 }
  0xc6   : > { %1196 = vmatmul.msk.f32.vlgmr.msra.gmra.mxu1 %vm502_vm0, %v1507_v1  ;;  %1197 = vmatmul.msk.f32.vlgmr.msra.gmra.mxu2 %vm502_vm0, %v1509_v2 }
  0xc7   : > { %776 = vmatpush.msrb.mxu2 %v711_v38 }
  0xc9   : > { %777 = vmatpush.msrb.mxu2 %v710_v39 }
  0xcb   : > { %778 = vmatpush.msrb.mxu2 %v709_v40 }
  0xcd   : > { %779 = vmatpush.msrb.mxu2 %v708_v48 }
 0x143   : > { %v599_v51 = vpop.f32.mrf.mxu1 }
 0x144   : > { %v600_v52 = vadd.f32 %v599_v51, %v574_v50 }
 0x146   : > { %v605_v55 = vmul.f32 %v600_v52, %v533_v49 }
 0x148   : > { %v610_v56 = vadd.f32 %v1260_v53, %v605_v55 }
 0x149   : > { %v602_v57 = vpop.f32.mrf.mxu2 }
 0x14a   : > { %v603_v58 = vadd.f32 %v602_v57, %v575_v45  ;;  %v1559_v59 = vmul.f32 %v615_v54, %v610_v56 }
 0x14c   : > { %v606_v61 = vmul.f32 %v603_v58, %v543_v44  ;;  %v624_v62 = vmax.f32 %v1559_v59, 0.0 }
 0x14e   : > { %v611_v63 = vadd.f32 %v1260_v53, %v606_v61  ;;  %v630_v0 = vmul.f32 %v1261_v60, %v624_v62 }
 0x150   : > { %v633_v4 = vsel %vm632_vm10, %v630_v0, 0.0  ;;  %v1568_v5 = vmul.f32 %v620_v3, %v611_v63 }
 0x151   : > { %634 = vadd.xlane.f32.xlu2 %v633_v4 }
 0x152   : > { %v625_v6 = vmax.f32 %v1568_v5, 0.0 }
 0x154   : > { %v631_v7 = vmul.f32 %v1261_v60, %v625_v6 }
 0x156   : > { %v636_v8 = vsel %vm632_vm10, %v631_v7, 0.0 }
 0x159   : > { %637 = vadd.xlane.f32.xlu2 %v636_v8 }
 0x1c4   : > { %v635_v10 = vpop.xlane.xlu2 %634 }
 0x1c5   : > { %v644_v11 = vsel %vm642_vm11, %v635_v10, 1e+30  ;;  %1269 = vtanh.f32 %v635_v10 }
 0x1c6   : > { %648 = vperm.xlu0 %1258, %v644_v11  }
 0x1cb   : > { %v1270_v49 = vpop.eup %1269 }
 0x1cc   : > { %v638_v12 = vpop.xlane.xlu2 %637 }
 0x1cd   : > { %v645_v15 = vsel %vm643_vm12, %v638_v12, 1e+30  ;;  %1271 = vtanh.f32 %v638_v12 }
 0x1ce   : > { %653 = vperm.xlu1 %1257, %v645_v15  }
 0x238   : > { %v649_v16 = vpop.permute.xlu0 %648 }
 0x239   : > { %v656_v18 = vsel %vm1535_vm3, %v649_v16, 0.0 }
 0x23a   : > { %v658_v22 = vsel %vm502_vm0, %v656_v18, 0.0 }
 0x240   : > { %v654_v19 = vpop.permute.xlu1 %653 }
 0x241   : > { %v657_v20 = vsel %vm1526_vm2, %v654_v19, 0.0 }
 0x242   : > { %v659_v23 = vsel %vm502_vm0, %v657_v20, 0.0 }
 0x243   : > { %v660_v24 = vadd.f32 %v659_v23, %v658_v22 }
 0x245   : > { %v661_v25 = vrot.slane %v660_v24, 4 }
 0x247   : > { %v662_v27 = vadd.f32 %v661_v25, %v660_v24 }
 0x249   : > { %v663_v28 = vrot.slane %v662_v27, 2 }
 0x24b   : > { %v664_v29 = vadd.f32 %v663_v28, %v662_v27 }
 0x24d   : > { %v665_v30 = vrot.slane %v664_v29, 1 }
 0x24f   : > { %v666_v32 = vadd.f32 %v665_v30, %v664_v29 }
 0x251   : > { %vm668_vm15 = vcmp.lt.f32.partialorder %v666_v32, %v638_v12  ;;  %vm670_vm1 = vcmp.eq.f32.partialorder %v666_v32, %v638_v12  ;;  %vm669_vm4 = vcmp.eq.f32.partialorder %v666_v32, %v635_v10  ;;  %vm667_vm6 = vcmp.lt.f32.partialorder %v666_v32, %v635_v10 }
 0x252   : > { %vm674_vm5 = vmand %vm670_vm1, %vm672_vm13 }
 0x253   : > { %vm676_vm7 = vmor %vm668_vm15, %vm674_vm5 }
 0x254   : > { %v678_v34 = vsel %vm676_vm7, 1.0, %v1365_v33  ;;  %vm673_vm8 = vmand %vm669_vm4, %vm671_vm14 }
 0x255   : > { %v682_v35 = vsel %vm502_vm0, %v678_v34, 0.0  ;;  %vm675_vm9 = vmor %vm667_vm6, %vm673_vm8 }
 0x256   : > { %683 = vadd.xlane.f32.xlu1 %v682_v35  ;;  %v677_v36 = vsel %vm675_vm9, 1.0, %v1365_v33 }
 0x257   : > { %v679_v37 = vsel %vm502_vm0, %v677_v36, 0.0 }
 0x258   : > { %680 = vadd.xlane.f32.xlu2 %v679_v37 }
 0x2c9   : > { %v684_v43 = vpop.xlane.xlu1 %683 }
 0x2ca   : > { %vm687_vm12 = vcmp.ge.f32.partialorder %v684_v43, %v685_v41 }
 0x2cb   : > { %v681_v42 = vpop.xlane.xlu2 %680  ;;  %v689_v46 = vsel %vm687_vm12, 1.0, %v1365_v33 }
 0x2cc   : > { %vm686_vm11 = vcmp.ge.f32.partialorder %v681_v42, %v685_v41  ;;  %v1615_v47 = vmul.f32 %v689_v46, %v1549_v31  ;;  %v1272_v31 = vpop.eup %1271 }
 0x2cd   : > { %v688_v44 = vsel %vm686_vm11, 1.0, %v1365_v33  ;;  %v695_v53 = vmul.f32 %v1272_v31, %v625_v6 }
 0x2ce   : > { %v1610_v45 = vmul.f32 %v688_v44, %v1546_v26  ;;  %v694_v26 = vmul.f32 %v1270_v49, %v624_v62  ;;  %vm857_vm9 = vcmp.gt.f32.partialorder %v1615_v47, 0.0 }
 0x2d0   : > { %698 = vperm.xlu2 %1259, %v1610_v45   ;;  %vm856_vm8 = vcmp.gt.f32.partialorder %v1610_v45, 0.0 }
 0x2d8   : > { %703 = vperm.xlu2 %1259, %v1615_v47  }
 0x32a   : > { %v1623_v50 = vpop.permute.xlu2 %698 }
 0x32b   : > { %v706_v51 = vmul.f32 %v1623_v50, %v694_v26  ;;  %v1629_v52 = vmul.f32 %v1623_v50, %v1507_v1  ;;  %v1262_v26 = vld [vmem:[%s1809_s7] ss:$0 sm:$0xff] }
 0x32d   : > { %1199 = vmatmul.msk.f32.vlgmr.msrb.gmra.mxu2 %vm632_vm10, %v706_v51  ;;  %v715_v57 = vsel %vm502_vm0, %v1629_v52, 0.0 }
 0x332   : > { %v1633_v54 = vpop.permute.xlu2 %703 }
 0x333   : > { %v714_v55 = vmul.f32 %v1633_v54, %v1509_v2  ;;  %v707_v56 = vmul.f32 %v1633_v54, %v695_v53 }
 0x335   : > { %v716_v58 = vsel %vm502_vm0, %v714_v55, 0.0  ;;  %1200 = vmatmul.msk.f32.gmra.mxu2 %vm632_vm10, %v707_v56  ;;  %v1263_v56 = vld [vmem:[%s1813_s11] ss:$0 sm:$0xff] }
 0x336   : > { %v717_v59 = vadd.f32 %v716_v58, %v715_v57 }
 0x338   : > { %v718_v60 = vrot.slane %v717_v59, 4 }
 0x33a   : > { %v719_v61 = vadd.f32 %v718_v60, %v717_v59 }
 0x33c   : > { %v720_v62 = vrot.slane %v719_v61, 2 }
 0x33e   : > { %v721_v63 = vadd.f32 %v720_v62, %v719_v61 }
 0x340   : > { %v722_v0 = vrot.slane %v721_v63, 1 }
 0x342   : > { %v723_v3 = vadd.f32 %v722_v0, %v721_v63 }
 0x344   : > { %v725_v4 = vsel %vm1526_vm2, %v723_v3, 0.0  ;;  %v724_v5 = vsel %vm1535_vm3, %v723_v3, 0.0 }
 0x345   : > { %v729_v6 = vsel %vm502_vm0, %v725_v4, 0.0  ;;  %v726_v7 = vsel %vm502_vm0, %v724_v5, 0.0 }
 0x346   : > { %730 = vadd.xlane.f32.xlu0 %v729_v6  ;;  %727 = vadd.xlane.f32.xlu2 %v726_v7 }
 0x3b0   : > { %v781_v38 = vpop.f32.mrf.mxu2 }
 0x3b8   : > { %v784_v39 = vpop.f32.mrf.mxu2 }
 0x3b9   : > { %v731_v8 = vpop.xlane.xlu0 %730  ;;  %v728_v10 = vpop.xlane.xlu2 %727 }
 0x3ba   : > { %v733_v11 = vmul.f32 %v731_v8, %v1615_v47  ;;  %v732_v12 = vmul.f32 %v728_v10, %v1610_v45 }
 0x3bc   : > { %v735_v15 = vadd.f32 1.0, %v733_v11  ;;  %v734_v16 = vadd.f32 1.0, %v732_v12 }
 0x3be   : > { %v737_v18 = vadd.f32 1e-05, %v735_v15  ;;  %v736_v19 = vadd.f32 1e-05, %v734_v16 }
 0x3c0   : > { %1273 = vrsqrt.f32 %v737_v18  ;;  %vm754_vm1 = vweird.f32 %v737_v18  ;;  %vm744_vm6 = vweird.f32 %v736_v19 }
 0x3c1   : > { %1275 = vrsqrt.f32 %v736_v19 }
 0x3c6   : > { %v1274_v20 = vpop.eup %1273 }
 0x3c7   : > { %v1276_v22 = vpop.eup %1275  ;;  %v749_v23 = vmul.f32 %v1274_v20, %v737_v18  ;;  %vm755_vm15 = vweird.f32 %v1274_v20 }
 0x3c8   : > { %v739_v24 = vmul.f32 %v1276_v22, %v736_v19  ;;  %vm756_vm4 = vmor %vm754_vm1, %vm755_vm15  ;;  %vm745_vm5 = vweird.f32 %v1276_v22 }
 0x3c9   : > { %v750_v25 = vmul.f32 %v1274_v20, %v749_v23  ;;  %vm746_vm7 = vmor %vm744_vm6, %vm745_vm5 }
 0x3ca   : > { %v740_v27 = vmul.f32 %v1276_v22, %v739_v24 }
 0x3cb   : > { %v751_v28 = vmul.f32 0.5, %v750_v25 }
 0x3cc   : > { %v741_v29 = vmul.f32 0.5, %v740_v27 }
 0x3cd   : > { %v752_v30 = vsub.f32 1.5, %v751_v28 }
 0x3ce   : > { %v742_v35 = vsub.f32 1.5, %v741_v29 }
 0x3cf   : > { %v753_v32 = vmul.f32 %v1274_v20, %v752_v30 }
 0x3d0   : > { %v743_v36 = vmul.f32 %v1276_v22, %v742_v35  ;;  %v923_v35 = vld [vmem:[%s1810_s8 + $0x18] sm:$0xff] }
 0x3d1   : > { %v757_v34 = vsel %vm756_vm4, %v1274_v20, %v753_v32  ;;  %988 = vmatpush.msrb.mxu0 %v923_v35  ;;  %v1264_v35 = vld [vmem:[%s1811_s9] ss:$0 sm:$0xff] }
 0x3d2   : > { %794 = vperm.xlu1 %1257, %v757_v34   ;;  %v747_v37 = vsel %vm746_vm7, %v1276_v22, %v743_v36  ;;  %v922_v36 = vld [vmem:[%s1810_s8 + $0x10] sm:$0xff] }
 0x3d3   : > { %989 = vmatpush.msrb.mxu0 %v922_v36 }
 0x3da   : > { %789 = vperm.xlu1 %1257, %v747_v37  }
 0x444   : > { %v795_v40 = vpop.permute.xlu1 %794 }
 0x445   : > { %v798_v41 = vmul.f32 %v795_v40, %v784_v39 }
 0x447   : > { %v800_v42 = vmul.f32 %v798_v41, %v1633_v54 }
 0x449   : > { %821 = vmatpush.msra.mxu3 %v800_v42 }
 0x44c   : > { %v790_v43 = vpop.permute.xlu1 %789 }
 0x44d   : > { %v797_v44 = vmul.f32 %v790_v43, %v781_v38 }
 0x44f   : > { %v799_v46 = vmul.f32 %v797_v44, %v1623_v50 }
 0x451   : > { %822 = vmatpush.msra.mxu3 %v799_v46 }
 0x452   : > { %1201 = vmatmul.msk.f32.vlgmr.msra.gmra.mxu3 %vm502_vm0, %v1629_v52 }
 0x45a   : > { %1202 = vmatmul.msk.f32.gmra.mxu3 %vm502_vm0, %v714_v55 }
 0x4d5   : > { %v824_v48 = vpop.f32.mrf.mxu3 }
 0x4d6   : > { %v825_v49 = vadd.f32 %v824_v48, %v797_v44 }
 0x4d8   : > { %v830_v51 = vmul.f32 %v825_v49, %v790_v43 }
 0x4da   : > { %v835_v31 = vadd.f32 %v1262_v26, %v830_v51 }
 0x4dc   : > { %v1659_v53 = vmul.f32 %v835_v31, %v1623_v50 }
 0x4dd   : > { %v827_v57 = vpop.f32.mrf.mxu3 }
 0x4de   : > { %v828_v58 = vadd.f32 %v827_v57, %v798_v41  ;;  %v839_v52 = vmax.f32 %v1659_v53, 0.0 }
 0x4e0   : > { %v831_v55 = vmul.f32 %v828_v58, %v795_v40  ;;  %v845_v59 = vmul.f32 %v1263_v56, %v839_v52 }
 0x4e2   : > { %v836_v60 = vadd.f32 %v1262_v26, %v831_v55  ;;  %v847_v61 = vsel %vm632_vm10, %v845_v59, 0.0 }
 0x4e3   : > { %848 = vadd.xlane.f32.xlu2 %v847_v61 }
 0x4e4   : > { %v1669_v62 = vmul.f32 %v836_v60, %v1633_v54 }
 0x4e6   : > { %v840_v50 = vmax.f32 %v1669_v62, 0.0 }
 0x4e8   : > { %v846_v63 = vmul.f32 %v1263_v56, %v840_v50 }
 0x4ea   : > { %v850_v0 = vsel %vm632_vm10, %v846_v63, 0.0 }
 0x4eb   : > { %851 = vadd.xlane.f32.xlu0 %v850_v0 }
 0x556   : > { %v849_v3 = vpop.xlane.xlu2 %848 }
 0x557   : > { %v858_v4 = vsel %vm856_vm8, %v849_v3, 1e+30  ;;  %1277 = vtanh.f32 %v849_v3 }
 0x558   : > { %862 = vperm.xlu1 %1257, %v858_v4  }
 0x55e   : > { %v852_v5 = vpop.xlane.xlu0 %851 }
 0x55f   : > { %v859_v6 = vsel %vm857_vm9, %v852_v5, 1e+30  ;;  %1279 = vtanh.f32 %v852_v5 }
 0x560   : > { %867 = vperm.xlu2 %1259, %v859_v6  }
 0x5ba   : > { %v868_v54 = vpop.permute.xlu2 %867 }
 0x5bb   : > { %v871_v7 = vsel %vm1526_vm2, %v868_v54, 0.0 }
 0x5bc   : > { %v873_v11 = vsel %vm502_vm0, %v871_v7, 0.0 }
 0x5ca   : > { %v863_v8 = vpop.permute.xlu1 %862 }
 0x5cb   : > { %v870_v10 = vsel %vm1535_vm3, %v863_v8, 0.0 }
 0x5cc   : > { %v872_v12 = vsel %vm502_vm0, %v870_v10, 0.0 }
 0x5cd   : > { %v874_v15 = vadd.f32 %v873_v11, %v872_v12 }
 0x5cf   : > { %v875_v16 = vrot.slane %v874_v15, 4 }
 0x5d1   : > { %v876_v18 = vadd.f32 %v875_v16, %v874_v15 }
 0x5d3   : > { %v877_v19 = vrot.slane %v876_v18, 2 }
 0x5d5   : > { %v878_v20 = vadd.f32 %v877_v19, %v876_v18 }
 0x5d7   : > { %v879_v22 = vrot.slane %v878_v20, 1 }
 0x5d9   : > { %v880_v23 = vadd.f32 %v879_v22, %v878_v20 }
 0x5db   : > { %vm882_vm11 = vcmp.lt.f32.partialorder %v880_v23, %v852_v5  ;;  %vm884_vm12 = vcmp.eq.f32.partialorder %v880_v23, %v852_v5  ;;  %vm883_vm15 = vcmp.eq.f32.partialorder %v880_v23, %v849_v3  ;;  %vm881_vm4 = vcmp.lt.f32.partialorder %v880_v23, %v849_v3 }
 0x5dc   : > { %vm886_vm1 = vmand %vm884_vm12, %vm672_vm13 }
 0x5dd   : > { %vm888_vm5 = vmor %vm882_vm11, %vm886_vm1 }
 0x5de   : > { %v890_v24 = vsel %vm888_vm5, 1.0, %v1365_v33  ;;  %vm885_vm6 = vmand %vm883_vm15, %vm671_vm14 }
 0x5df   : > { %v894_v25 = vsel %vm502_vm0, %v890_v24, 0.0  ;;  %vm887_vm7 = vmor %vm881_vm4, %vm885_vm6 }
 0x5e0   : > { %895 = vadd.xlane.f32.xlu1 %v894_v25  ;;  %v889_v27 = vsel %vm887_vm7, 1.0, %v1365_v33 }
 0x5e1   : > { %v891_v28 = vsel %vm502_vm0, %v889_v27, 0.0 }
 0x5e2   : > { %892 = vadd.xlane.f32.xlu0 %v891_v28 }
 0x653   : > { %v896_v29 = vpop.xlane.xlu1 %895 }
 0x654   : > { %vm899_vm13 = vcmp.ge.f32.partialorder %v896_v29, %v897_v13  ;;  %v1064_v29 = vld [vmem:[%s1814_s12 + $0x10] sm:$0xff] }
 0x655   : > { %v901_v30 = vsel %vm899_vm13, 1.0, %v1365_v33  ;;  %v893_v9 = vpop.xlane.xlu0 %892 }
 0x656   : > { %v903_v14 = vmul.f32 %v901_v30, %v1615_v47  ;;  %vm898_vm14 = vcmp.ge.f32.partialorder %v893_v9, %v897_v13  ;;  %v921_v47 = vld [vmem:[%s1810_s8 + $0x8] sm:$0xff]  ;;  %v1065_v13 = vld [vmem:[%s1814_s12 + $0x18] sm:$0xff]  ;;  %v1062_v9 = vld [vmem:[%s1814_s12] sm:$0xff] }
 0x657   : > { %v900_v32 = vsel %vm898_vm14, 1.0, %v1365_v33  ;;  %990 = vmatpush.msrb.mxu0 %v921_v47  ;;  %v920_v33 = vld [vmem:[%s1810_s8] sm:$0xff]  ;;  %1082 = vmatpush.msrb.mxu3 %v1065_v13  ;;  %v1063_v30 = vld [vmem:[%s1814_s12 + $0x8] sm:$0xff] }
 0x658   : > { %v902_v34 = vmul.f32 %v900_v32, %v1610_v45  ;;  %915 = vperm.xlu2 %1259, %v903_v14   ;;  %v1278_v45 = vpop.eup %1277 }
 0x659   : > { %991 = vmatpush.msrb.mxu0 %v920_v33  ;;  %v906_v39 = vmul.f32 %v1278_v45, %v839_v52  ;;  %1083 = vmatpush.msrb.mxu3 %v1064_v29 }
 0x65a   : > { %910 = vperm.xlu0 %1258, %v902_v34  }
 0x65b   : > { %1084 = vmatpush.msrb.mxu3 %v1063_v30 }
 0x65d   : > { %1085 = vmatpush.msrb.mxu3 %v1062_v9 }
 0x6b2   : > { %v1711_v37 = vpop.permute.xlu2 %915 }
 0x6b3   : > { %v1715_v38 = vmul.f32 %v1711_v37, %v1509_v2  ;;  %v1280_v2 = vpop.eup %1279 }
 0x6b4   : > { %v907_v49 = vmul.f32 %v1280_v2, %v840_v50 }
 0x6b5   : > { %v928_v43 = vsel %vm502_vm0, %v1715_v38, 0.0 }
 0x6b6   : > { %v919_v51 = vmul.f32 %v1711_v37, %v907_v49 }
 0x6cc   : > { %v1719_v40 = vpop.permute.xlu0 %910 }
 0x6cd   : > { %v918_v41 = vmul.f32 %v1719_v40, %v906_v39  ;;  %v1724_v42 = vmul.f32 %v1719_v40, %v1507_v1 }
 0x6cf   : > { %v927_v44 = vsel %vm502_vm0, %v1724_v42, 0.0  ;;  %1203 = vmatmul.msk.f32.vlgmr.msrb.gmra.mxu0 %vm632_vm10, %v918_v41 }
 0x6d0   : > { %v929_v46 = vadd.f32 %v928_v43, %v927_v44 }
 0x6d2   : > { %v930_v48 = vrot.slane %v929_v46, 4 }
 0x6d4   : > { %v931_v26 = vadd.f32 %v930_v48, %v929_v46 }
 0x6d6   : > { %v932_v31 = vrot.slane %v931_v26, 2 }
 0x6d7   : > { %1204 = vmatmul.msk.f32.gmra.mxu0 %vm632_vm10, %v919_v51 }
 0x6d8   : > { %v933_v1 = vadd.f32 %v932_v31, %v931_v26 }
 0x6da   : > { %v934_v53 = vrot.slane %v933_v1, 1 }
 0x6dc   : > { %v935_v56 = vadd.f32 %v934_v53, %v933_v1 }
 0x6de   : > { %v937_v57 = vsel %vm1526_vm2, %v935_v56, 0.0  ;;  %v936_v58 = vsel %vm1535_vm3, %v935_v56, 0.0 }
 0x6df   : > { %v941_v52 = vsel %vm502_vm0, %v937_v57, 0.0  ;;  %v938_v55 = vsel %vm502_vm0, %v936_v58, 0.0 }
 0x6e0   : > { %942 = vadd.xlane.f32.xlu0 %v941_v52  ;;  %939 = vadd.xlane.f32.xlu2 %v938_v55 }
 0x74c   : > { %v993_v19 = vpop.f32.mrf.mxu0 }
 0x753   : > { %v943_v59 = vpop.xlane.xlu0 %942  ;;  %v940_v60 = vpop.xlane.xlu2 %939 }
 0x754   : > { %v945_v61 = vmul.f32 %v943_v59, %v903_v14  ;;  %v944_v62 = vmul.f32 %v940_v60, %v902_v34  ;;  %v996_v20 = vpop.f32.mrf.mxu0 }
 0x756   : > { %v947_v50 = vadd.f32 1.0, %v945_v61  ;;  %v946_v63 = vadd.f32 1.0, %v944_v62 }
 0x758   : > { %v949_v0 = vadd.f32 1e-05, %v947_v50  ;;  %v948_v3 = vadd.f32 1e-05, %v946_v63 }
 0x75a   : > { %1281 = vrsqrt.f32 %v949_v0  ;;  %vm966_vm3 = vweird.f32 %v949_v0  ;;  %vm956_vm11 = vweird.f32 %v948_v3 }
 0x75b   : > { %1283 = vrsqrt.f32 %v948_v3 }
 0x760   : > { %v1282_v17 = vpop.eup %1281 }
 0x761   : > { %v1284_v4 = vpop.eup %1283  ;;  %v961_v21 = vmul.f32 %v1282_v17, %v949_v0  ;;  %vm967_vm2 = vweird.f32 %v1282_v17 }
 0x762   : > { %v951_v5 = vmul.f32 %v1284_v4, %v948_v3  ;;  %vm968_vm8 = vmor %vm966_vm3, %vm967_vm2  ;;  %vm957_vm9 = vweird.f32 %v1284_v4 }
 0x763   : > { %v962_v6 = vmul.f32 %v1282_v17, %v961_v21  ;;  %vm958_vm12 = vmor %vm956_vm11, %vm957_vm9 }
 0x764   : > { %v952_v54 = vmul.f32 %v1284_v4, %v951_v5 }
 0x765   : > { %v963_v7 = vmul.f32 0.5, %v962_v6 }
 0x766   : > { %v953_v8 = vmul.f32 0.5, %v952_v54 }
 0x767   : > { %v964_v10 = vsub.f32 1.5, %v963_v7 }
 0x768   : > { %v954_v15 = vsub.f32 1.5, %v953_v8 }
 0x769   : > { %v965_v11 = vmul.f32 %v1282_v17, %v964_v10 }
 0x76a   : > { %v955_v16 = vmul.f32 %v1284_v4, %v954_v15 }
 0x76b   : > { %v969_v12 = vsel %vm968_vm8, %v1282_v17, %v965_v11 }
 0x76c   : > { %1006 = vperm.xlu1 %1257, %v969_v12   ;;  %v959_v18 = vsel %vm958_vm12, %v1284_v4, %v955_v16 }
 0x774   : > { %1001 = vperm.xlu1 %1257, %v959_v18  }
 0x7de   : > { %v1007_v22 = vpop.permute.xlu1 %1006 }
 0x7df   : > { %v1010_v23 = vmul.f32 %v1007_v22, %v996_v20 }
 0x7e1   : > { %v1012_v24 = vmul.f32 %v1010_v23, %v1711_v37 }
 0x7e3   : > { %1033 = vmatpush.msrb.mxu1 %v1012_v24 }
 0x7e6   : > { %v1002_v25 = vpop.permute.xlu1 %1001 }
 0x7e7   : > { %v1009_v27 = vmul.f32 %v1002_v25, %v993_v19 }
 0x7e9   : > { %v1011_v28 = vmul.f32 %v1009_v27, %v1719_v40 }
 0x7eb   : > { %1034 = vmatpush.msrb.mxu1 %v1011_v28 }
 0x7ec   : > { %1205 = vmatmul.msk.f32.vlgmr.msrb.gmra.mxu1 %vm502_vm0, %v1724_v42 }
 0x7f4   : > { %1206 = vmatmul.msk.f32.gmra.mxu1 %vm502_vm0, %v1715_v38  ;;  %vm1090_vm0 = vcmask 24576  }
 0x869   : > { %v1036_v14 = vpop.f32.mrf.mxu1 }
 0x86a   : > { %v1037_v32 = vadd.f32 %v1036_v14, %v1009_v27 }
 0x86c   : > { %v1042_v34 = vmul.f32 %v1037_v32, %v1002_v25 }
 0x86e   : > { %v1047_v36 = vadd.f32 %v1264_v35, %v1042_v34 }
 0x870   : > { %v1049_v45 = vmul.f32 %v1047_v36, %v1719_v40 }
 0x871   : > { %v1039_v47 = vpop.f32.mrf.mxu1 }
 0x872   : > { %v1040_v33 = vadd.f32 %v1039_v47, %v1010_v23  ;;  %v1051_v41 = vmax.f32 %v1049_v45, 0.0 }
 0x874   : > { %v1043_v38 = vmul.f32 %v1040_v33, %v1007_v22  ;;  %v1053_v44 = vsel %vm632_vm10, %v1051_v41, -inf }
 0x876   : > { %v1048_v39 = vadd.f32 %v1264_v35, %v1043_v38 }
 0x878   : > { %v1050_v42 = vmul.f32 %v1048_v39, %v1711_v37  ;;  %v1066_v37 = vld [vmem:[%s1815_s13] sm:$0x1] }
 0x87a   : > { %v1052_v43 = vmax.f32 %v1050_v42, 0.0 }
 0x87c   : > { %v1054_v2 = vsel %vm632_vm10, %v1052_v43, -inf }
 0x87d   : > { %v1055_v46 = vmax.f32 %v1053_v44, %v1054_v2 }
 0x87f   : > { %v1056_v48 = vrot.slane %v1055_v46, 4 }
 0x881   : > { %v1057_v49 = vmax.f32 %v1055_v46, %v1056_v48 }
 0x883   : > { %v1058_v26 = vrot.slane %v1057_v49, 2 }
 0x885   : > { %v1059_v51 = vmax.f32 %v1057_v49, %v1058_v26 }
 0x887   : > { %v1060_v31 = vrot.slane %v1059_v51, 1 }
 0x889   : > { %v1061_v1 = vmax.f32 %v1059_v51, %v1060_v31 }
 0x88b   : > { %1207 = vmatmul.msk.f32.vlgmr.msrb.gmra.mxu3 %vm632_vm10, %v1061_v1 }
 0x90e   : > { %v1087_v40 = vpop.f32.mrf.mxu3 }
 0x90f   : > { %v1088_v53 = vadd.f32 %v1087_v40, %v1066_v37 }
 0x911   : > { %1091 = vst.msk [vmem:[%s471_s24] sm:$0x1] %vm1090_vm0, %v1088_v53 }
 0x912   : > { %1324 = shalt.err (!%p1321_p3)
}
 0x913   : > { %1215 = dma.vmem_to_hbm [thread:$0]  (%p1482_p5), %s1104_s19, 16, %s1106_s28, %s1093_s29  }
 0x914 PF: > { %p1221_p4 = scmp.ge.s32.totalorder %s1361_s20, 2  ;;  %s1117_s30 = sand.u32 1, %s1349_s17  }
 0x915   : > { %s1118_s23 = scalar_lea.sflag [#allocation5], %s1117_s30 }
 0x916   : > { %p1218_p7 = pnand %p1221_p4, %p1486_p6 }
 0x918   : > { %p1219_p8 = pneg %p1218_p7 }
 0x91a   : > { %1344 = dma.done.wait (%p1219_p8), %s1118_s23, 16  }
 0x91b   : > { %1346 = vsyncadd (%p1219_p8), %s1118_s23, 4294967280  ;;  %s1830_s1 = sld [smem:[#allocation8_spill]]  ;;  %p32_p9 = scmp.ge.s32.totalorder %s1469_s22, 4  }
 0x91c   : > { %s1831_s19 = sld [smem:[#allocation9_spill]]  ;;  %s1832_s17 = smov %s1353_s18 }
 0x91d   : > { %s1834_s20 = smov %s1469_s22  ;;  %34 = sbr.rel (!%p32_p9) target bundleno = 10 (0xa), region = 113 }
 0x921   : > { %s1833_s18 = smov %s1830_s1 }
 0x922   :  { %1123 = vsyncpa [#allocation5], 1 }
 0x923   :  { %1125 = vsyncpa [#allocation5 + $0x1], 1 }

</bundles_post_ra>
